<compile_context>
chip_gen: v6e
topology: v6e:2x2x1
jax: 0.10.0
libtpu: 0.0.40
codegen_flags: <defaults>
</compile_context>

<pallas_src>
import jax
import jax.numpy as jnp
from jax.experimental import pallas as pl
from jax.experimental.pallas import tpu as pltpu

IN_DIM = 512   # fixed by the module spec
OUT_DIM = 10   # fixed by the module spec


def linrelu_kernel(x_ref, wt_ref, b_ref, o_ref):
    # x_ref:  (bm, IN_DIM)      bf16
    # wt_ref: (IN_DIM, OUT_DIM) bf16  (W.T, resident across grid steps)
    # b_ref:  (1, OUT_DIM)      f32   (resident across grid steps)
    # o_ref:  (bm, OUT_DIM)     f32
    z = jnp.dot(x_ref[...], wt_ref[...],
                preferred_element_type=jnp.float32)      # MXU, f32 accum
    z = z + b_ref[...]                                   # VPU, f32
    o_ref[...] = jnp.maximum(z, 0.0)                     # ReLU, f32 store


def mynetworkblock_forward(x, w, b, *, bm=128):
    """x: (B, IN_DIM) f32; w: (OUT_DIM, IN_DIM) f32; b: (OUT_DIM,) f32.

    Returns relu(x @ w.T + b) as (B, OUT_DIM) f32.
    """
    B, K = x.shape
    O, K2 = w.shape
    assert K == K2 == IN_DIM and O == OUT_DIM

    # Row-tile size: multiple of 8 sublanes, no larger than needed.
    bm = max(8, min(bm, ((B + 7) // 8) * 8))
    # Pad the batch up to a multiple of bm so the grid tiles evenly.
    Bp = ((B + bm - 1) // bm) * bm
    x_p = jnp.pad(x, ((0, Bp - B), (0, 0))) if Bp != B else x

    # bf16 operands for the MXU (accumulation stays f32 in-kernel).
    x_bf = x_p.astype(jnp.bfloat16)
    wt_bf = w.T.astype(jnp.bfloat16)          # (IN_DIM, OUT_DIM)
    b2 = b.reshape(1, O).astype(jnp.float32)

    grid = (Bp // bm,)

    cost = pl.CostEstimate(
        flops=2 * Bp * K * O,
        transcendentals=0,
        bytes_accessed=int(x_bf.size * 2 + wt_bf.size * 2 + b2.size * 4
                           + Bp * O * 4),
    )

    out = pl.pallas_call(
        linrelu_kernel,
        out_shape=jax.ShapeDtypeStruct((Bp, O), jnp.float32),
        grid=grid,
        in_specs=[
            pl.BlockSpec((bm, K), lambda i: (i, 0)),   # x row tile
            pl.BlockSpec((K, O), lambda i: (0, 0)),    # W.T (resident)
            pl.BlockSpec((1, O), lambda i: (0, 0)),    # bias (resident)
        ],
        out_specs=pl.BlockSpec((bm, O), lambda i: (i, 0)),
        compiler_params=pltpu.CompilerParams(
            dimension_semantics=("parallel",)),
        cost_estimate=cost,
    )(x_bf, wt_bf, b2)

    return out[:B] if Bp != B else out


def mynetworkblock_reference(x, w, b):
    """Pure-JAX reference mirroring the PyTorch forward."""
    return jnp.maximum(x @ w.T + b, 0.0)


if __name__ == "__main__":
    key = jax.random.PRNGKey(0)
    kx, kw, kb = jax.random.split(key, 3)

    # Small batch consistent with the module (in_dim=512, out_dim=10); two
    # row tiles of bm=128 -> 2 parallel grid steps (keeps both v7x TCs busy).
    B = 256
    x = jax.random.normal(kx, (B, IN_DIM), jnp.float32)
    w = 0.05 * jax.random.normal(kw, (OUT_DIM, IN_DIM), jnp.float32)  # (out, in)
    b = 0.05 * jax.random.normal(kb, (OUT_DIM,), jnp.float32)

    out = jax.block_until_ready(mynetworkblock_forward(x, w, b))
    ref = jax.block_until_ready(mynetworkblock_reference(x, w, b))

    assert out.shape == ref.shape == (B, OUT_DIM)
    max_err = float(jnp.max(jnp.abs(out - ref)))
    assert jnp.allclose(out, ref, rtol=2e-2, atol=2e-2), max_err

    print("KERNEL_OK")
</pallas_src>

<mosaic_0001>
module attributes {stable_mosaic.version = 11 : i64} {
  func.func @linrelu_kernel(%arg0: i32, %arg1: memref<128x512xbf16, #tpu.memory_space<vmem>>, %arg2: memref<512x10xbf16, #tpu.memory_space<vmem>>, %arg3: memref<1x10xf32, #tpu.memory_space<vmem>>, %arg4: memref<128x10xf32, #tpu.memory_space<vmem>>) attributes {dimension_semantics = [#tpu.dimension_semantics<parallel>], iteration_bounds = array<i64: 2>, scalar_prefetch = 0 : i64, scratch_operands = 0 : i64, tpu.core_type = #tpu.core_type<tc>, window_params = [{transform_indices = @transform_0, window_bounds = array<i64: 128, 512>}, {pipeline_mode = #tpu.pipeline_mode<synchronous>, transform_indices = @transform_1, window_bounds = array<i64: 512, 10>}, {pipeline_mode = #tpu.pipeline_mode<synchronous>, transform_indices = @transform_2, window_bounds = array<i64: 1, 10>}, {transform_indices = @transform_3, window_bounds = array<i64: 128, 10>}]} {
    %c0 = arith.constant 0 : index
    %c0_0 = arith.constant 0 : index
    %0 = vector.load %arg1[%c0, %c0_0] : memref<128x512xbf16, #tpu.memory_space<vmem>>, vector<128x512xbf16>
    %c0_1 = arith.constant 0 : index
    %c0_2 = arith.constant 0 : index
    %1 = vector.load %arg2[%c0_1, %c0_2] : memref<512x10xbf16, #tpu.memory_space<vmem>>, vector<512x10xbf16>
    %cst = arith.constant dense<0.000000e+00> : vector<128x10xf32>
    %2 = tpu.matmul %0, %1, %cst {dimension_numbers = #tpu.dot_dimension_numbers<[1], [0], [0], [1], [0, 0, 1, 1], [], []>} : vector<128x512xbf16>, vector<512x10xbf16>, vector<128x10xf32> -> vector<128x10xf32>
    %c0_3 = arith.constant 0 : index
    %c0_4 = arith.constant 0 : index
    %3 = vector.load %arg3[%c0_3, %c0_4] : memref<1x10xf32, #tpu.memory_space<vmem>>, vector<1x10xf32>
    %4 = vector.broadcast %3 : vector<1x10xf32> to vector<128x10xf32>
    %5 = arith.addf %2, %4 : vector<128x10xf32>
    %cst_5 = arith.constant 0.000000e+00 : f32
    %6 = vector.broadcast %cst_5 : f32 to vector<128x10xf32>
    %7 = arith.maximumf %5, %6 : vector<128x10xf32>
    %c0_6 = arith.constant 0 : index
    %c0_7 = arith.constant 0 : index
    %8 = vector.load %arg4[%c0_6, %c0_7] : memref<128x10xf32, #tpu.memory_space<vmem>>, vector<128x10xf32>
    tpu.vector_store %arg4[%c0_6, %c0_7], %7 {strides = array<i32>} : memref<128x10xf32, #tpu.memory_space<vmem>>, vector<128x10xf32>,
    return
  }
  func.func @transform_0(%arg0: i32) -> (i32, i32) {
    %c0_i32 = arith.constant 0 : i32
    %c0_i32_0 = arith.constant 0 : i32
    return %arg0, %c0_i32 : i32, i32
  }
  func.func @transform_1(%arg0: i32) -> (i32, i32) {
    %c0_i32 = arith.constant 0 : i32
    %c0_i32_0 = arith.constant 0 : i32
    %c0_i32_1 = arith.constant 0 : i32
    return %c0_i32, %c0_i32_0 : i32, i32
  }
  func.func @transform_2(%arg0: i32) -> (i32, i32) {
    %c0_i32 = arith.constant 0 : i32
    %c0_i32_0 = arith.constant 0 : i32
    %c0_i32_1 = arith.constant 0 : i32
    return %c0_i32, %c0_i32_0 : i32, i32
  }
  func.func @transform_3(%arg0: i32) -> (i32, i32) {
    %c0_i32 = arith.constant 0 : i32
    %c0_i32_0 = arith.constant 0 : i32
    return %arg0, %c0_i32 : i32, i32
  }
}

</mosaic_0001>

<bundles_post_ra>
// kernel: tpu_custom_call.1
= control target key start
LH: loop header
LB: loop body
LE: loop exit
PB: predicated region body
PF: predicated region fallthrough
CT: control target
= control target key end

     0   :  { %8 = vsyncpa [#allocation3], 0  ;;  %s1646_s0 = inlined_call_operand.hbm [shape: bf16[256,512], index: 0, kind: input, shape index: {}]   ;;  %s1647_s1 = inlined_call_operand.vmem [shape: bf16[512,10], index: 1, kind: input, shape index: {}]   ;;  %s1648_s2 = inlined_call_operand.vmem [shape: f32[1,10], index: 2, kind: input, shape index: {}]   ;;  %s1649_s3 = inlined_call_operand.vmem [shape: f32[256,10], index: 3, kind: output, shape index: {}]  }
   0x1   :  { %10 = vsyncpa [#allocation3 + $0x1], 0  ;;  %s1361_s12 = smov 0   ;;  %s1363_s13 = smov 0  }
   0x2   :  { %s1365_s14 = smov 0   ;;  %s1367_s15 = smov 0  }
   0x3 LB: > { %s944_s16 = sadd.s32 4294967295, %s1336_s15   ;;  %s1381_s17 = sadd.s32 1, %s1336_s15   ;;  %s1336_s15 = sphi %s1367_s15, %s1658_s15   ;;  %s1332_s14 = sphi %s1365_s14, %s1657_s14   ;;  %s1328_s13 = sphi %s1363_s13, %s1656_s13   ;;  %s1324_s12 = sphi %s1361_s12, %s1655_s12  }
   0x4   : > { %s20_s18 = ssub.s32 %s1336_s15, %s1381_s17  ;;  %s23_s19 = sadd.s32 1, %s1332_s14 }
   0x5   : > { %p21_p0 = scmp.eq.s32.totalorder %s20_s18, 0  ;;  %p30_p1 = scmp.ne.s32.totalorder %s1332_s14, %s1328_s13 }
   0x6   : > { %p31_p2 = scmp.eq.s32.totalorder %s1336_s15, 0  ;;  %p36_p3 = scmp.ne.s32.totalorder %s1328_s13, %s1324_s12 }
   0x7   : > { %s1391_s20 = scalar_select %p21_p0, %s1332_s14, %s23_s19  }
   0x8   : > { %p32_p4 = por %p31_p2, %p30_p1  ;;  %p37_p5 = scmp.eq.s32.totalorder %s944_s16, 0 }
   0x9   : > { %p1159_p6 = scmp.lt.s32.totalorder %s1336_s15, 2  ;;  %s134_s22 = sand.u32 1, %s1332_s14  }
   0xa   : > { %p1396_p7 = por %p37_p5, %p36_p3  ;;  %s948_s23 = sshll.u32 %s134_s22, 8 }
   0xb   : > { %s1024_s24 = sshll.u32 %s1336_s15, 12  ;;  %s138_s28 = scalar_lea.vmem [#allocation2], %s948_s23 }
   0xc   : > { %s1651_s21 = scalar_select %p1396_p7, 1, 0 }
   0xd   : > { %s1405_s27 = scalar_lea.hbm %s1646_s0, %s1024_s24  ;;  %s146_s29 = sshll.u32 %s138_s28, 4  ;;  %s1407_s29 = int_to_ptr.vmem [resolvable:$true] %s146_s29 }
   0xe   : > { %p1409_p8 = pnand %p1159_p6, %p32_p4  ;;  %s1414_s4 = scalar_lea.sflag [#allocation3], %s134_s22 }
   0xf   : > { %s1274_s5 = scalar_lea.hbm %s1405_s27, 4096  ;;  %s1279_s8 = scalar_lea.hbm %s1646_s0, 8192 }
  0x10   : > { %p1275_p10 = scmp.ne.s32.totalorder %s1405_s27, %s1274_s5  ;;  %p1276_p11 = pneg %p1409_p8 }
  0x11   : > { %p1280_p0 = scmp.lt.s32.totalorder %s1405_s27, %s1646_s0  ;;  %p1281_p1 = scmp.lt.s32.totalorder %s1279_s8, %s1274_s5 }
  0x12   : > { %p1277_p12 = pnand %p1276_p11, %p1275_p10 }
  0x13   : > { %p1282_p2 = por %p1281_p1, %p1280_p0 }
  0x14   : > { %p1278_p13 = pneg %p1277_p12 }
  0x16   : > { %p1283_p3 = pnand %p1282_p2, %p1278_p13 }
  0x18   : > { %1286 = shalt.err (!%p1283_p3)
}
  0x19   : > { %s1287_s11 = scalar_lea.vmem %s1407_s29, 4096  ;;  %s1338_s12 = smov [#allocation2]  }
  0x1a   : > { %p1288_p4 = scmp.ne.s32.totalorder %s1407_s29, %s1287_s11  ;;  %s1292_s18 = sshll.u32 %s1338_s12, 4  ;;  %s1293_s18 = int_to_ptr.vmem [resolvable:$false] %s1292_s18 }
  0x1b   : > { %s1294_s19 = scalar_lea.vmem %s1293_s18, 8192  ;;  %p1295_p10 = scmp.lt.s32.totalorder %s1407_s29, %s1293_s18 }
  0x1c   : > { %p1290_p5 = pnand %p1288_p4, %p1276_p11  ;;  %p1296_p12 = scmp.lt.s32.totalorder %s1294_s19, %s1287_s11 }
  0x1e   : > { %p1291_p6 = pneg %p1290_p5  ;;  %p1297_p9 = por %p1296_p12, %p1295_p10 }
  0x20   : > { %p1298_p7 = pnand %p1297_p9, %p1291_p6 }
  0x22   : > { %1301 = shalt.err (!%p1298_p7)
}
  0x23   : > { %s1339_s22 = smov 256   ;;  %s1340_s23 = smov 16  }
  0x24   : > { %1158 = dma.hbm_to_vmem [thread:$0]  (!%p1409_p8), %s1405_s27, 4096, %s1407_s29, %s1414_s4, %s1339_s22, %s1339_s22, %s1340_s23  }
  0x25   : > { %p154_p11 = scmp.lt.s32.totalorder %s1336_s15, 3  ;;  %p1653_p13 = scmp.ge.s32.totalorder %s1336_s15, 1 }
  0x27   : > { %p155_p0 = pnand %p1653_p13, %p154_p11 }
  0x28   : > { %s160_s24 = sand.u32 (!%p155_p0), 1, %s1328_s13   ;;  %p1654_p7 = scmp.ne.s32.totalorder (!%p155_p0), %s1651_s21, 0 }
  0x29   : > { %158 = sbr.rel (%p155_p0) target bundleno = 345 (0x159), region = 32  ;;  %s953_s25 = sshll.u32 (!%p155_p0), %s160_s24, 8 }
  0x2a   : > { %s161_s26 = scalar_lea.sflag (!%p155_p0), [#allocation3], %s160_s24  ;;  %s1439_s28 = scalar_lea.vmem (!%p155_p0), [#allocation2], %s953_s25 }
  0x2e   : > { %1319 = dma.done.wait (%p1654_p7), %s161_s26, 4096  }
  0x2f   : > { %1321 = vsyncadd (%p1654_p7), %s161_s26, 4294963200  ;;  %v1194_v0 = vld [vmem:[%s1647_s1 + $0x78] sm:$0xff]   ;;  %v1198_v4 = vld [vmem:[%s1647_s1 + $0x70] sm:$0xff]   ;;  %s954_s30 = sshll.u32 %s944_s16, 4  ;;  %vm860_vm0 = vcmask 80896  }
  0x30   : > { %v1195_v1 = vld [vmem:[%s1647_s1 + $0xf8] sm:$0xff]   ;;  %1025 = vmatprep.subr.bf16.mxu0 %v1194_v0  ;;  %v1199_v5 = vld [vmem:[%s1647_s1 + $0xf0] sm:$0xff]   ;;  %v1202_v8 = vld [vmem:[%s1647_s1 + $0x68] sm:$0xff]   ;;  %p189_p8 = scmp.lt.s32.totalorder %s954_s30, 31 }
  0x31   : > { %v1196_v2 = vld [vmem:[%s1647_s1 + $0x38] sm:$0xff]   ;;  %1089 = vmatprep.subr.bf16.mxu1 %v1195_v1  ;;  %v1200_v6 = vld [vmem:[%s1647_s1 + $0x30] sm:$0xff]   ;;  %v1203_v9 = vld [vmem:[%s1647_s1 + $0xe8] sm:$0xff]  }
  0x32   : > { %v1197_v3 = vld [vmem:[%s1647_s1 + $0xb8] sm:$0xff]   ;;  %1026 = vmatpush3.bf16.msra.mxu0 %v1196_v2  ;;  %v1201_v7 = vld [vmem:[%s1647_s1 + $0xb0] sm:$0xff]   ;;  %v1204_v10 = vld [vmem:[%s1647_s1 + $0x28] sm:$0xff]   ;;  %s1660_s30 = smov (!%p189_p8, %s954_s30), 31 }
  0x33   : > { %1090 = vmatpush3.bf16.msra.mxu1 %v1197_v3  ;;  %1027 = vmatprep.subr.bf16.mxu0 %v1198_v4  ;;  %v1205_v11 = vld [vmem:[%s1647_s1 + $0xa8] sm:$0xff]   ;;  %v1206_v12 = vld [vmem:[%s1647_s1 + $0x60] sm:$0xff]   ;;  %v1210_v16 = vld [vmem:[%s1647_s1 + $0x58] sm:$0xff]  }
  0x34   : > { %1091 = vmatprep.subr.bf16.mxu1 %v1199_v5  ;;  %v1207_v13 = vld [vmem:[%s1647_s1 + $0xe0] sm:$0xff]   ;;  %v1211_v17 = vld [vmem:[%s1647_s1 + $0xd8] sm:$0xff]   ;;  %v1214_v20 = vld [vmem:[%s1647_s1 + $0x50] sm:$0xff]  }
  0x35   : > { %v1208_v14 = vld [vmem:[%s1647_s1 + $0x20] sm:$0xff]   ;;  %v1212_v18 = vld [vmem:[%s1647_s1 + $0x18] sm:$0xff]   ;;  %v1215_v21 = vld [vmem:[%s1647_s1 + $0xd0] sm:$0xff]  }
  0x36   : > { %1028 = vmatpush3.bf16.msra.mxu0 %v1200_v6  ;;  %v1209_v15 = vld [vmem:[%s1647_s1 + $0xa0] sm:$0xff]   ;;  %v1213_v19 = vld [vmem:[%s1647_s1 + $0x98] sm:$0xff]   ;;  %v1216_v22 = vld [vmem:[%s1647_s1 + $0x10] sm:$0xff]  }
  0x37   : > { %1092 = vmatpush3.bf16.msra.mxu1 %v1201_v7  ;;  %1029 = vmatprep.subr.bf16.mxu0 %v1202_v8  ;;  %v1217_v23 = vld [vmem:[%s1647_s1 + $0x90] sm:$0xff]   ;;  %v1218_v24 = vld [vmem:[%s1647_s1 + $0x48] sm:$0xff]   ;;  %v1222_v28 = vld [vmem:[%s1647_s1 + $0x40] sm:$0xff]  }
  0x38   : > { %1093 = vmatprep.subr.bf16.mxu1 %v1203_v9  ;;  %v1219_v25 = vld [vmem:[%s1647_s1 + $0xc8] sm:$0xff]   ;;  %v1223_v29 = vld [vmem:[%s1647_s1 + $0xc0] sm:$0xff]  }
  0x39   : > { %v1220_v26 = vld [vmem:[%s1647_s1 + $0x8] sm:$0xff]   ;;  %v1224_v30 = vld [vmem:[%s1647_s1] sm:$0xff]  }
  0x3a   : > { %1030 = vmatpush3.bf16.msra.mxu0 %v1204_v10  ;;  %v1221_v27 = vld [vmem:[%s1647_s1 + $0x88] sm:$0xff]   ;;  %v1225_v31 = vld [vmem:[%s1647_s1 + $0x80] sm:$0xff]  }
  0x3b   : > { %1094 = vmatpush3.bf16.msra.mxu1 %v1205_v11  ;;  %1031 = vmatprep.subr.bf16.mxu0 %v1206_v12  ;;  %v1226_v32 = vld [vmem:[%s1439_s28] ss:$16 sps:$4 sm:$0xff]   ;;  %v1228_v33 = vld [vmem:[%s1439_s28 + $0x4] ss:$16 sps:$4 sm:$0xff]   ;;  %v1229_v34 = vld [vmem:[%s1439_s28 + $0x8] ss:$16 sps:$4 sm:$0xff]  }
  0x3c   : > { %1095 = vmatprep.subr.bf16.mxu1 %v1207_v13  ;;  %v1231_v35 = vld [vmem:[%s1439_s28 + $0xc] ss:$16 sps:$4 sm:$0xff]   ;;  %682 = vmatprep.mubr.bf16.mxu0 %v1228_v33  ;;  %v1232_v36 = vld [vmem:[%s1439_s28 + $0x24] ss:$16 sps:$4 sm:$0xff]   ;;  %v1236_v38 = vld [vmem:[%s1439_s28 + $0x20] ss:$16 sps:$4 sm:$0xff]  }
  0x3d   : > { %779 = vmatprep.mubr.bf16.mxu1 %v1231_v35  ;;  %v1234_v37 = vld [vmem:[%s1439_s28 + $0x2c] ss:$16 sps:$4 sm:$0xff]   ;;  %v1237_v39 = vld [vmem:[%s1439_s28 + $0x28] ss:$16 sps:$4 sm:$0xff]   ;;  %v1238_v40 = vld [vmem:[%s1439_s28 + $0x44] ss:$16 sps:$4 sm:$0xff]  }
  0x3e   : > { %1032 = vmatpush3.bf16.msra.mxu0 %v1208_v14  ;;  %v1240_v41 = vld [vmem:[%s1439_s28 + $0x4c] ss:$16 sps:$4 sm:$0xff]   ;;  %v1242_v42 = vld [vmem:[%s1439_s28 + $0x40] ss:$16 sps:$4 sm:$0xff]   ;;  %v1243_v43 = vld [vmem:[%s1439_s28 + $0x48] ss:$16 sps:$4 sm:$0xff]  }
  0x3f   : > { %1096 = vmatpush3.bf16.msra.mxu1 %v1209_v15  ;;  %1033 = vmatprep.subr.bf16.mxu0 %v1210_v16  ;;  %v1244_v44 = vld [vmem:[%s1439_s28 + $0x64] ss:$16 sps:$4 sm:$0xff]   ;;  %v1246_v45 = vld [vmem:[%s1439_s28 + $0x6c] ss:$16 sps:$4 sm:$0xff]   ;;  %v1248_v46 = vld [vmem:[%s1439_s28 + $0x60] ss:$16 sps:$4 sm:$0xff]  }
  0x40   : > { %1097 = vmatprep.subr.bf16.mxu1 %v1211_v17  ;;  %v1249_v47 = vld [vmem:[%s1439_s28 + $0x68] ss:$16 sps:$4 sm:$0xff]   ;;  %v1250_v48 = vld [vmem:[%s1439_s28 + $0x84] ss:$16 sps:$4 sm:$0xff]   ;;  %v1252_v49 = vld [vmem:[%s1439_s28 + $0x8c] ss:$16 sps:$4 sm:$0xff]  }
  0x41   : > { %v1254_v50 = vld [vmem:[%s1439_s28 + $0x80] ss:$16 sps:$4 sm:$0xff]   ;;  %v1255_v51 = vld [vmem:[%s1439_s28 + $0x88] ss:$16 sps:$4 sm:$0xff]   ;;  %v1256_v52 = vld [vmem:[%s1439_s28 + $0xa4] ss:$16 sps:$4 sm:$0xff]  }
  0x42   : > { %1034 = vmatpush3.bf16.msra.mxu0 %v1212_v18  ;;  %v1258_v53 = vld [vmem:[%s1439_s28 + $0xac] ss:$16 sps:$4 sm:$0xff]   ;;  %v1260_v54 = vld [vmem:[%s1439_s28 + $0xa0] ss:$16 sps:$4 sm:$0xff]   ;;  %v1261_v55 = vld [vmem:[%s1439_s28 + $0xa8] ss:$16 sps:$4 sm:$0xff]  }
  0x43   : > { %1098 = vmatpush3.bf16.msra.mxu1 %v1213_v19  ;;  %1035 = vmatprep.subr.bf16.mxu0 %v1214_v20  ;;  %v1262_v56 = vld [vmem:[%s1439_s28 + $0xc4] ss:$16 sps:$4 sm:$0xff]   ;;  %v1264_v57 = vld [vmem:[%s1439_s28 + $0xcc] ss:$16 sps:$4 sm:$0xff]   ;;  %v1266_v58 = vld [vmem:[%s1439_s28 + $0xc0] ss:$16 sps:$4 sm:$0xff]  }
  0x44   : > { %1099 = vmatprep.subr.bf16.mxu1 %v1215_v21  ;;  %v1267_v59 = vld [vmem:[%s1439_s28 + $0xc8] ss:$16 sps:$4 sm:$0xff]   ;;  %v1268_v60 = vld [vmem:[%s1439_s28 + $0xe4] ss:$16 sps:$4 sm:$0xff]   ;;  %v1270_v61 = vld [vmem:[%s1439_s28 + $0xec] ss:$16 sps:$4 sm:$0xff]  }
  0x45   : > { %v1272_v62 = vld [vmem:[%s1439_s28 + $0xe0] ss:$16 sps:$4 sm:$0xff]   ;;  %v1273_v63 = vld [vmem:[%s1439_s28 + $0xe8] ss:$16 sps:$4 sm:$0xff]   ;;  %s955_s28 = sshll.u32 %s1660_s30, 3 }
  0x46   : > { %1036 = vmatpush3.bf16.msra.mxu0 %v1216_v22  ;;  %v1578_v2 = vld [vmem:[%s1648_s2] ss:$0 sm:$0xff]  ;;  %s1584_s8 = scalar_lea.vmem %s1649_s3, %s955_s28 }
  0x47   : > { %1100 = vmatpush3.bf16.msra.mxu1 %v1217_v23  ;;  %1037 = vmatprep.subr.bf16.mxu0 %v1218_v24 }
  0x48   : > { %1101 = vmatprep.subr.bf16.mxu1 %v1219_v25 }
  0x4a   : > { %1038 = vmatpush3.bf16.msra.mxu0 %v1220_v26 }
  0x4b   : > { %1102 = vmatpush3.bf16.msra.mxu1 %v1221_v27  ;;  %1039 = vmatprep.subr.bf16.mxu0 %v1222_v28 }
  0x4c   : > { %1103 = vmatprep.subr.bf16.mxu1 %v1223_v29 }
  0x4e   : > { %1040 = vmatpush3.bf16.msra.mxu0 %v1224_v30 }
  0x4f   : > { %1104 = vmatpush3.bf16.msra.mxu1 %v1225_v31 }
  0x51   : > { %683 = vmatmul.mubr.bf16.vlgmr.msra.gmra.mxu0 %v1226_v32 }
  0x52   : > { %780 = vmatmul.mubr.bf16.vlgmr.msra.gmra.mxu1 %v1229_v34  ;;  %690 = vmatprep.mubr.bf16.mxu0 %v1232_v36 }
  0x53   : > { %787 = vmatprep.mubr.bf16.mxu1 %v1234_v37 }
  0x59   : > { %691 = vmatmul.mubr.bf16.gmra.mxu0 %v1236_v38 }
  0x5a   : > { %788 = vmatmul.mubr.bf16.gmra.mxu1 %v1237_v39  ;;  %698 = vmatprep.mubr.bf16.mxu0 %v1238_v40 }
  0x5b   : > { %795 = vmatprep.mubr.bf16.mxu1 %v1240_v41 }
  0x61   : > { %699 = vmatmul.mubr.bf16.gmra.mxu0 %v1242_v42 }
  0x62   : > { %796 = vmatmul.mubr.bf16.gmra.mxu1 %v1243_v43  ;;  %706 = vmatprep.mubr.bf16.mxu0 %v1244_v44 }
  0x63   : > { %803 = vmatprep.mubr.bf16.mxu1 %v1246_v45 }
  0x69   : > { %707 = vmatmul.mubr.bf16.gmra.mxu0 %v1248_v46 }
  0x6a   : > { %804 = vmatmul.mubr.bf16.gmra.mxu1 %v1249_v47  ;;  %714 = vmatprep.mubr.bf16.mxu0 %v1250_v48 }
  0x6b   : > { %811 = vmatprep.mubr.bf16.mxu1 %v1252_v49 }
  0x71   : > { %715 = vmatmul.mubr.bf16.gmra.mxu0 %v1254_v50 }
  0x72   : > { %812 = vmatmul.mubr.bf16.gmra.mxu1 %v1255_v51  ;;  %722 = vmatprep.mubr.bf16.mxu0 %v1256_v52 }
  0x73   : > { %819 = vmatprep.mubr.bf16.mxu1 %v1258_v53 }
  0x79   : > { %723 = vmatmul.mubr.bf16.gmra.mxu0 %v1260_v54 }
  0x7a   : > { %820 = vmatmul.mubr.bf16.gmra.mxu1 %v1261_v55  ;;  %730 = vmatprep.mubr.bf16.mxu0 %v1262_v56 }
  0x7b   : > { %827 = vmatprep.mubr.bf16.mxu1 %v1264_v57 }
  0x81   : > { %731 = vmatmul.mubr.bf16.gmra.mxu0 %v1266_v58 }
  0x82   : > { %828 = vmatmul.mubr.bf16.gmra.mxu1 %v1267_v59  ;;  %738 = vmatprep.mubr.bf16.mxu0 %v1268_v60 }
  0x83   : > { %835 = vmatprep.mubr.bf16.mxu1 %v1270_v61 }
  0x89   : > { %739 = vmatmul.mubr.bf16.gmra.mxu0 %v1272_v62 }
  0x8a   : > { %836 = vmatmul.mubr.bf16.gmra.mxu1 %v1273_v63 }
 0x111   : > { %v1041_v0 = vpop.f32.mrf.mxu0 }
 0x112   : > { %v1105_v1 = vpop.f32.mrf.mxu1 }
 0x113   : > { %v1042_v3 = vpop.f32.mrf.mxu0 }
 0x114   : > { %v1043_v4 = vadd.f32 %v1042_v3, %v1041_v0  ;;  %v1106_v5 = vpop.f32.mrf.mxu1 }
 0x115   : > { %v1044_v6 = vpop.f32.mrf.mxu0  ;;  %v1107_v8 = vadd.f32 %v1106_v5, %v1105_v1 }
 0x116   : > { %v685_v7 = vadd.f32 %v1043_v4, %v1578_v2  ;;  %v1108_v9 = vpop.f32.mrf.mxu1 }
 0x117   : > { %v1045_v10 = vpop.f32.mrf.mxu0 }
 0x118   : > { %v782_v11 = vadd.f32 %v1107_v8, %v685_v7  ;;  %v1046_v12 = vadd.f32 %v1045_v10, %v1044_v6  ;;  %v1109_v13 = vpop.f32.mrf.mxu1 }
 0x119   : > { %v1047_v14 = vpop.f32.mrf.mxu0  ;;  %v1110_v17 = vadd.f32 %v1109_v13, %v1108_v9 }
 0x11a   : > { %v844_v15 = vmax.f32 %v782_v11, 0.0  ;;  %v688_v16 = vadd.f32 %v1046_v12, %v1578_v2  ;;  %v1111_v18 = vpop.f32.mrf.mxu1 }
 0x11b   : > { %v1048_v19 = vpop.f32.mrf.mxu0 }
 0x11c   : > { %861 = vst.msk [vmem:[%s1584_s8] sm:$0xff] %vm860_vm0, %v844_v15  ;;  %v785_v20 = vadd.f32 %v1110_v17, %v688_v16  ;;  %v1049_v21 = vadd.f32 %v1048_v19, %v1047_v14  ;;  %v1112_v22 = vpop.f32.mrf.mxu1 }
 0x11d   : > { %v1050_v23 = vpop.f32.mrf.mxu0  ;;  %v1113_v26 = vadd.f32 %v1112_v22, %v1111_v18 }
 0x11e   : > { %v845_v24 = vmax.f32 %v785_v20, 0.0  ;;  %v693_v25 = vadd.f32 %v1049_v21, %v1578_v2  ;;  %v1114_v27 = vpop.f32.mrf.mxu1 }
 0x11f   : > { %v1051_v28 = vpop.f32.mrf.mxu0 }
 0x120   : > { %862 = vst.msk [vmem:[%s1584_s8 + $0x8] sm:$0xff] %vm860_vm0, %v845_v24  ;;  %v790_v29 = vadd.f32 %v1113_v26, %v693_v25  ;;  %v1052_v30 = vadd.f32 %v1051_v28, %v1050_v23  ;;  %v1115_v31 = vpop.f32.mrf.mxu1 }
 0x121   : > { %v1053_v32 = vpop.f32.mrf.mxu0  ;;  %v1116_v35 = vadd.f32 %v1115_v31, %v1114_v27 }
 0x122   : > { %v846_v33 = vmax.f32 %v790_v29, 0.0  ;;  %v696_v34 = vadd.f32 %v1052_v30, %v1578_v2  ;;  %v1117_v36 = vpop.f32.mrf.mxu1 }
 0x123   : > { %v1054_v37 = vpop.f32.mrf.mxu0 }
 0x124   : > { %863 = vst.msk [vmem:[%s1584_s8 + $0x10] sm:$0xff] %vm860_vm0, %v846_v33  ;;  %v793_v38 = vadd.f32 %v1116_v35, %v696_v34  ;;  %v1055_v39 = vadd.f32 %v1054_v37, %v1053_v32  ;;  %v1118_v40 = vpop.f32.mrf.mxu1 }
 0x125   : > { %v1056_v41 = vpop.f32.mrf.mxu0  ;;  %v1119_v44 = vadd.f32 %v1118_v40, %v1117_v36 }
 0x126   : > { %v847_v42 = vmax.f32 %v793_v38, 0.0  ;;  %v701_v43 = vadd.f32 %v1055_v39, %v1578_v2  ;;  %v1120_v45 = vpop.f32.mrf.mxu1 }
 0x127   : > { %v1057_v46 = vpop.f32.mrf.mxu0 }
 0x128   : > { %864 = vst.msk [vmem:[%s1584_s8 + $0x18] sm:$0xff] %vm860_vm0, %v847_v42  ;;  %v798_v47 = vadd.f32 %v1119_v44, %v701_v43  ;;  %v1058_v48 = vadd.f32 %v1057_v46, %v1056_v41  ;;  %v1121_v49 = vpop.f32.mrf.mxu1 }
 0x129   : > { %v1059_v50 = vpop.f32.mrf.mxu0  ;;  %v1122_v53 = vadd.f32 %v1121_v49, %v1120_v45 }
 0x12a   : > { %v848_v51 = vmax.f32 %v798_v47, 0.0  ;;  %v704_v52 = vadd.f32 %v1058_v48, %v1578_v2  ;;  %v1123_v54 = vpop.f32.mrf.mxu1 }
 0x12b   : > { %v1060_v55 = vpop.f32.mrf.mxu0 }
 0x12c   : > { %865 = vst.msk [vmem:[%s1584_s8 + $0x20] sm:$0xff] %vm860_vm0, %v848_v51  ;;  %v801_v56 = vadd.f32 %v1122_v53, %v704_v52  ;;  %v1061_v57 = vadd.f32 %v1060_v55, %v1059_v50  ;;  %v1124_v58 = vpop.f32.mrf.mxu1 }
 0x12d   : > { %v1062_v59 = vpop.f32.mrf.mxu0  ;;  %v1125_v62 = vadd.f32 %v1124_v58, %v1123_v54 }
 0x12e   : > { %v849_v60 = vmax.f32 %v801_v56, 0.0  ;;  %v709_v61 = vadd.f32 %v1061_v57, %v1578_v2  ;;  %v1126_v63 = vpop.f32.mrf.mxu1 }
 0x12f   : > { %v1063_v0 = vpop.f32.mrf.mxu0 }
 0x130   : > { %866 = vst.msk [vmem:[%s1584_s8 + $0x28] sm:$0xff] %vm860_vm0, %v849_v60  ;;  %v806_v1 = vadd.f32 %v1125_v62, %v709_v61  ;;  %v1064_v3 = vadd.f32 %v1063_v0, %v1062_v59  ;;  %v1127_v4 = vpop.f32.mrf.mxu1 }
 0x131   : > { %v1065_v5 = vpop.f32.mrf.mxu0  ;;  %v1128_v8 = vadd.f32 %v1127_v4, %v1126_v63 }
 0x132   : > { %v850_v6 = vmax.f32 %v806_v1, 0.0  ;;  %v712_v7 = vadd.f32 %v1064_v3, %v1578_v2  ;;  %v1129_v9 = vpop.f32.mrf.mxu1 }
 0x133   : > { %v1066_v10 = vpop.f32.mrf.mxu0 }
 0x134   : > { %867 = vst.msk [vmem:[%s1584_s8 + $0x30] sm:$0xff] %vm860_vm0, %v850_v6  ;;  %v809_v11 = vadd.f32 %v1128_v8, %v712_v7  ;;  %v1067_v12 = vadd.f32 %v1066_v10, %v1065_v5  ;;  %v1130_v13 = vpop.f32.mrf.mxu1 }
 0x135   : > { %v1068_v14 = vpop.f32.mrf.mxu0  ;;  %v1131_v17 = vadd.f32 %v1130_v13, %v1129_v9 }
 0x136   : > { %v851_v15 = vmax.f32 %v809_v11, 0.0  ;;  %v717_v16 = vadd.f32 %v1067_v12, %v1578_v2  ;;  %v1132_v18 = vpop.f32.mrf.mxu1 }
 0x137   : > { %v1069_v19 = vpop.f32.mrf.mxu0 }
 0x138   : > { %868 = vst.msk [vmem:[%s1584_s8 + $0x38] sm:$0xff] %vm860_vm0, %v851_v15  ;;  %v814_v20 = vadd.f32 %v1131_v17, %v717_v16  ;;  %v1070_v21 = vadd.f32 %v1069_v19, %v1068_v14  ;;  %v1133_v22 = vpop.f32.mrf.mxu1 }
 0x139   : > { %v1071_v23 = vpop.f32.mrf.mxu0  ;;  %v1134_v26 = vadd.f32 %v1133_v22, %v1132_v18 }
 0x13a   : > { %v852_v24 = vmax.f32 %v814_v20, 0.0  ;;  %v720_v25 = vadd.f32 %v1070_v21, %v1578_v2  ;;  %v1135_v27 = vpop.f32.mrf.mxu1 }
 0x13b   : > { %v1072_v28 = vpop.f32.mrf.mxu0 }
 0x13c   : > { %869 = vst.msk [vmem:[%s1584_s8 + $0x40] sm:$0xff] %vm860_vm0, %v852_v24  ;;  %v817_v29 = vadd.f32 %v1134_v26, %v720_v25  ;;  %v1073_v30 = vadd.f32 %v1072_v28, %v1071_v23  ;;  %v1136_v31 = vpop.f32.mrf.mxu1 }
 0x13d   : > { %v1074_v32 = vpop.f32.mrf.mxu0  ;;  %v1137_v35 = vadd.f32 %v1136_v31, %v1135_v27 }
 0x13e   : > { %v853_v33 = vmax.f32 %v817_v29, 0.0  ;;  %v725_v34 = vadd.f32 %v1073_v30, %v1578_v2  ;;  %v1138_v36 = vpop.f32.mrf.mxu1 }
 0x13f   : > { %v1075_v37 = vpop.f32.mrf.mxu0 }
 0x140   : > { %870 = vst.msk [vmem:[%s1584_s8 + $0x48] sm:$0xff] %vm860_vm0, %v853_v33  ;;  %v822_v38 = vadd.f32 %v1137_v35, %v725_v34  ;;  %v1076_v39 = vadd.f32 %v1075_v37, %v1074_v32  ;;  %v1139_v40 = vpop.f32.mrf.mxu1 }
 0x141   : > { %v1077_v41 = vpop.f32.mrf.mxu0  ;;  %v1140_v44 = vadd.f32 %v1139_v40, %v1138_v36 }
 0x142   : > { %v854_v42 = vmax.f32 %v822_v38, 0.0  ;;  %v728_v43 = vadd.f32 %v1076_v39, %v1578_v2  ;;  %v1141_v45 = vpop.f32.mrf.mxu1 }
 0x143   : > { %v1078_v46 = vpop.f32.mrf.mxu0 }
 0x144   : > { %871 = vst.msk [vmem:[%s1584_s8 + $0x50] sm:$0xff] %vm860_vm0, %v854_v42  ;;  %v825_v47 = vadd.f32 %v1140_v44, %v728_v43  ;;  %v1079_v48 = vadd.f32 %v1078_v46, %v1077_v41  ;;  %v1142_v49 = vpop.f32.mrf.mxu1 }
 0x145   : > { %v1080_v50 = vpop.f32.mrf.mxu0  ;;  %v1143_v53 = vadd.f32 %v1142_v49, %v1141_v45 }
 0x146   : > { %v855_v51 = vmax.f32 %v825_v47, 0.0  ;;  %v733_v52 = vadd.f32 %v1079_v48, %v1578_v2  ;;  %v1144_v54 = vpop.f32.mrf.mxu1 }
 0x147   : > { %v1081_v55 = vpop.f32.mrf.mxu0 }
 0x148   : > { %872 = vst.msk [vmem:[%s1584_s8 + $0x58] sm:$0xff] %vm860_vm0, %v855_v51  ;;  %v830_v56 = vadd.f32 %v1143_v53, %v733_v52  ;;  %v1082_v57 = vadd.f32 %v1081_v55, %v1080_v50  ;;  %v1145_v58 = vpop.f32.mrf.mxu1 }
 0x149   : > { %v1083_v59 = vpop.f32.mrf.mxu0  ;;  %v1146_v62 = vadd.f32 %v1145_v58, %v1144_v54 }
 0x14a   : > { %v856_v60 = vmax.f32 %v830_v56, 0.0  ;;  %v736_v61 = vadd.f32 %v1082_v57, %v1578_v2  ;;  %v1147_v63 = vpop.f32.mrf.mxu1 }
 0x14b   : > { %v1084_v0 = vpop.f32.mrf.mxu0 }
 0x14c   : > { %873 = vst.msk [vmem:[%s1584_s8 + $0x60] sm:$0xff] %vm860_vm0, %v856_v60  ;;  %v833_v1 = vadd.f32 %v1146_v62, %v736_v61  ;;  %v1085_v3 = vadd.f32 %v1084_v0, %v1083_v59  ;;  %v1148_v4 = vpop.f32.mrf.mxu1 }
 0x14d   : > { %v1086_v5 = vpop.f32.mrf.mxu0  ;;  %v1149_v8 = vadd.f32 %v1148_v4, %v1147_v63 }
 0x14e   : > { %v857_v6 = vmax.f32 %v833_v1, 0.0  ;;  %v741_v7 = vadd.f32 %v1085_v3, %v1578_v2  ;;  %v1150_v9 = vpop.f32.mrf.mxu1 }
 0x14f   : > { %v1087_v10 = vpop.f32.mrf.mxu0 }
 0x150   : > { %874 = vst.msk [vmem:[%s1584_s8 + $0x68] sm:$0xff] %vm860_vm0, %v857_v6  ;;  %v838_v11 = vadd.f32 %v1149_v8, %v741_v7  ;;  %v1088_v12 = vadd.f32 %v1087_v10, %v1086_v5  ;;  %v1151_v13 = vpop.f32.mrf.mxu1 }
 0x151   : > { %v1152_v16 = vadd.f32 %v1151_v13, %v1150_v9 }
 0x152   : > { %v858_v14 = vmax.f32 %v838_v11, 0.0  ;;  %v744_v15 = vadd.f32 %v1088_v12, %v1578_v2 }
 0x154   : > { %875 = vst.msk [vmem:[%s1584_s8 + $0x70] sm:$0xff] %vm860_vm0, %v858_v14  ;;  %v841_v17 = vadd.f32 %v1152_v16, %v744_v15 }
 0x156   : > { %v859_v18 = vmax.f32 %v841_v17, 0.0 }
 0x158   : > { %876 = vst.msk [vmem:[%s1584_s8 + $0x78] sm:$0xff] %vm860_vm0, %v859_v18 }
 0x159 PF: > { %p13_p9 = scmp.ge.s32.totalorder %s1381_s17, 4   ;;  %s1655_s12 = smov %s1328_s13 }
 0x15a   : > { %s1656_s13 = smov %s1332_s14  ;;  %s1657_s14 = smov %s1391_s20 }
 0x15b   : > { %s1658_s15 = smov %s1381_s17  ;;  %15 = sbr.rel (!%p13_p9) target bundleno = 3 (0x3), region = 72 }
 0x160   :  { %899 = vsyncpa [#allocation3], 1 }
 0x161   :  { %901 = vsyncpa [#allocation3 + $0x1], 1 }

</bundles_post_ra>
